<compile_context>
chip_gen: v7x
topology: tpu7x:2x2x1
jax: 0.10.0
libtpu: 0.0.40
codegen_flags: <defaults>
</compile_context>

<pallas_src>
import math
import jax
import jax.numpy as jnp
from jax import lax
from jax.experimental import pallas as pl
from jax.experimental.pallas import tpu as pltpu
from typing import NamedTuple


def _round_up(x, m):
    return (x + m - 1) // m * m


def _gelu_exact(x):
    # matches torch.nn.GELU() default (erf-based, not tanh approximation)
    return 0.5 * x * (1.0 + lax.erf(x * 0.7071067811865476))


def _usable_vmem_bytes():
    """75% of physical VMEM per TensorCore; conservative 64 MiB (v7x) fallback."""
    phys = 64 * 1024 * 1024
    try:
        phys = int(pltpu.get_tpu_info().vmem_capacity_bytes)
    except Exception:
        pass
    return (phys * 3) // 4


def _choose_e_pad(E):
    """Lane-dense padding; prefer 256-alignment (v6e/v7x MXU width) when waste is modest."""
    e128 = _round_up(E, 128)
    if e128 % 256 == 0:
        return e128
    e256 = _round_up(E, 256)
    if (e256 - E) * 4 <= E:          # <= 25% extra padding
        return e256
    return e128


def _footprint_bytes(tm, th, e_pad, cbytes, obytes, use_acc):
    """Conservative VMEM footprint of one grid step (inputs/outputs double-buffered)."""
    f = 2 * tm * e_pad * cbytes                      # x tile
    f += 2 * tm * e_pad * obytes                     # out tile
    f += 2 * (e_pad * th + th * e_pad) * cbytes      # weight slabs
    f += 2 * (th + e_pad) * 4                        # bias slices
    f += tm * th * 4                                 # f32 hidden intermediate
    if use_acc:
        f += tm * e_pad * 4                          # f32 accumulator scratch
    return f


# ----------------------------------------------------------------------------- kernels
def _mlp_kernel_fused(x_ref, w1_ref, b1_ref, w2_ref, b2_ref, o_ref):
    # weights fully resident (nk == 1): one pass, no accumulator.
    h = jnp.dot(x_ref[...], w1_ref[...], preferred_element_type=jnp.float32)
    h = _gelu_exact(h + b1_ref[...])
    y = jnp.dot(h.astype(w2_ref.dtype), w2_ref[...], preferred_element_type=jnp.float32)
    o_ref[...] = (y + b2_ref[...]).astype(o_ref.dtype)


def _mlp_kernel_ktiled_f32out(x_ref, w1_ref, b1_ref, w2_ref, b2_ref, o_ref):
    # hidden (K) axis tiled; output is f32 so accumulate directly into the resident o_ref.
    k = pl.program_id(1)

    @pl.when(k == 0)
    def _():
        o_ref[...] = jnp.zeros_like(o_ref)

    h = jnp.dot(x_ref[...], w1_ref[...], preferred_element_type=jnp.float32)
    h = _gelu_exact(h + b1_ref[...])
    o_ref[...] += jnp.dot(h.astype(w2_ref.dtype), w2_ref[...],
                          preferred_element_type=jnp.float32)

    @pl.when(k == pl.num_programs(1) - 1)
    def _():
        o_ref[...] += b2_ref[...]


def _mlp_kernel_ktiled_acc(x_ref, w1_ref, b1_ref, w2_ref, b2_ref, o_ref, acc_ref):
    # hidden (K) axis tiled, non-f32 output: f32 VMEM accumulator + finalize cast.
    k = pl.program_id(1)

    @pl.when(k == 0)
    def _():
        acc_ref[...] = jnp.zeros_like(acc_ref)

    h = jnp.dot(x_ref[...], w1_ref[...], preferred_element_type=jnp.float32)
    h = _gelu_exact(h + b1_ref[...])
    acc_ref[...] += jnp.dot(h.astype(w2_ref.dtype), w2_ref[...],
                            preferred_element_type=jnp.float32)

    @pl.when(k == pl.num_programs(1) - 1)
    def _():
        o_ref[...] = (acc_ref[...] + b2_ref[...]).astype(o_ref.dtype)


# ----------------------------------------------------------------------------- wrapper
class PreparedMLP(NamedTuple):
    w1: jax.Array   # (nk, E_pad, th)  compute_dtype, contiguous slabs
    b1: jax.Array   # (nk, 1, th)      float32
    w2: jax.Array   # (nk, th, E_pad)  compute_dtype
    b2: jax.Array   # (1, E_pad)       float32
    E: int
    H: int
    E_pad: int
    H_pad: int
    th: int
    nk: int


def prepare_mlp_params(w_fc, b_fc, w_proj, b_proj, *, compute_dtype=jnp.bfloat16, th=None):
    """Pad/cast/slab-tile the MLP weights once (hoisted out of the per-call hot path).

    w_fc: (E, H), b_fc: (H,), w_proj: (H, E), b_proj: (E,).
    """
    E, H = w_fc.shape
    E_pad = _choose_e_pad(E)
    H128 = _round_up(H, 128)
    cbytes = jnp.dtype(compute_dtype).itemsize
    usable = _usable_vmem_bytes()

    if th is None:
        # weights-resident fast path if the full hidden dim fits alongside a modest row tile
        if _footprint_bytes(256, H128, E_pad, cbytes, 4, use_acc=False) <= usable:
            th = H128
        else:
            th = 512                                  # contiguous-slab K-tiling fallback
            while th > 128 and _footprint_bytes(256, th, E_pad, cbytes, 4, True) > usable:
                th //= 2
    th = min(_round_up(th, 128), H128)
    H_pad = _round_up(H128, th)
    nk = H_pad // th

    w1p = jnp.zeros((E_pad, H_pad), compute_dtype).at[:E, :H].set(w_fc.astype(compute_dtype))
    w1 = w1p.reshape(E_pad, nk, th).transpose(1, 0, 2)            # (nk, E_pad, th) slabs
    b1 = (jnp.zeros((1, H_pad), jnp.float32)
          .at[:, :H].set(b_fc.reshape(1, H).astype(jnp.float32))
          .reshape(nk, 1, th))
    w2 = (jnp.zeros((H_pad, E_pad), compute_dtype)
          .at[:H, :E].set(w_proj.astype(compute_dtype))
          .reshape(nk, th, E_pad))
    b2 = jnp.zeros((1, E_pad), jnp.float32).at[:, :E].set(
        b_proj.reshape(1, E).astype(jnp.float32))
    return PreparedMLP(w1, b1, w2, b2, E, H, E_pad, H_pad, th, nk)


def mlp_forward(x, params: PreparedMLP, *, tm=None):
    """x: (B, T, E). Returns (B, T, E) in x.dtype. dropout = identity (eval mode)."""
    B, T, E = x.shape
    assert E == params.E, "embedding dim mismatch with prepared params"
    M = B * T
    out_dtype = x.dtype
    E_pad, H_pad, th, nk = params.E_pad, params.H_pad, params.th, params.nk
    cdt = params.w1.dtype
    cbytes = jnp.dtype(cdt).itemsize
    obytes = jnp.dtype(out_dtype).itemsize
    usable = _usable_vmem_bytes()
    use_acc = (nk > 1) and (out_dtype != jnp.float32)

    # --- row tile: target 1024, shrink only if the VMEM budget requires it ---
    tm_target = 1024 if tm is None else tm
    tm_eff = max(8, min(_round_up(tm_target, 8), _round_up(M, 8)))
    while tm_eff > 8 and _footprint_bytes(tm_eff, th, E_pad, cbytes, obytes, use_acc) > usable:
        tm_eff = max(8, _round_up(tm_eff // 2, 8))
    M_pad = _round_up(M, tm_eff)
    nrows = M_pad // tm_eff

    # --- activations: pad/cast only when actually needed ---
    x2 = x.reshape(M, E)
    if (x2.dtype != cdt) or (M_pad != M) or (E_pad != E):
        x2 = jnp.zeros((M_pad, E_pad), cdt).at[:M, :E].set(x2.astype(cdt))

    # --- kernel variant selection ---
    if nk == 1:
        kernel, scratch = _mlp_kernel_fused, []
    elif out_dtype == jnp.float32:
        kernel, scratch = _mlp_kernel_ktiled_f32out, []
    else:
        kernel, scratch = _mlp_kernel_ktiled_acc, [pltpu.VMEM((tm_eff, E_pad), jnp.float32)]

    need = _footprint_bytes(tm_eff, th, E_pad, cbytes, obytes, use_acc)
    vmem_limit = int(min(usable, max(int(need * 5 // 4), 32 * 1024 * 1024)))

    weight_passes = 1 if nk == 1 else nrows           # weights re-streamed per row tile if K-tiled
    cost = pl.CostEstimate(
        flops=4 * M_pad * E_pad * H_pad,
        transcendentals=M_pad * H_pad,
        bytes_accessed=int(M_pad * E_pad * (cbytes + obytes)
                           + weight_passes * 2 * H_pad * E_pad * cbytes
                           + (H_pad + E_pad) * 4),
    )

    out = pl.pallas_call(
        kernel,
        out_shape=jax.ShapeDtypeStruct((M_pad, E_pad), out_dtype),
        grid_spec=pltpu.PrefetchScalarGridSpec(
            num_scalar_prefetch=0,
            grid=(nrows, nk),
            in_specs=[
                pl.BlockSpec((tm_eff, E_pad), lambda i, k: (i, 0)),
                pl.BlockSpec((None, E_pad, th), lambda i, k: (k, 0, 0)),   # contiguous W1 slab
                pl.BlockSpec((None, 1, th), lambda i, k: (k, 0, 0)),
                pl.BlockSpec((None, th, E_pad), lambda i, k: (k, 0, 0)),   # contiguous W2 slab
                pl.BlockSpec((1, E_pad), lambda i, k: (0, 0)),
            ],
            out_specs=pl.BlockSpec((tm_eff, E_pad), lambda i, k: (i, 0)),
            scratch_shapes=scratch,
        ),
        compiler_params=pltpu.CompilerParams(
            dimension_semantics=("parallel", "arbitrary"),
            vmem_limit_bytes=vmem_limit,
        ),
        cost_estimate=cost,
    )(x2, params.w1, params.b1, params.w2, params.b2)

    if (M_pad != M) or (E_pad != E):
        out = out[:M, :E]
    return out.reshape(B, T, E)


# ----------------------------------------------------------------------------- self-test
if __name__ == "__main__":
    def ref_mlp(x, w_fc, b_fc, w_proj, b_proj):
        B, T, E = x.shape
        h = x.reshape(-1, E).astype(jnp.float32) @ w_fc + b_fc.reshape(1, -1)
        h = 0.5 * h * (1.0 + lax.erf(h / jnp.sqrt(2.0)))
        return (h @ w_proj + b_proj.reshape(1, -1)).reshape(B, T, E)

    def make_params(key, E, H):
        k1, k2, k3, k4 = jax.random.split(key, 4)
        b1 = 1.0 / math.sqrt(E)
        b2 = 1.0 / math.sqrt(H)
        w_fc = jax.random.uniform(k1, (E, H), jnp.float32, -b1, b1)
        b_fc = jax.random.uniform(k2, (H,), jnp.float32, -b1, b1)
        w_proj = jax.random.uniform(k3, (H, E), jnp.float32, -b2, b2)
        b_proj = jax.random.uniform(k4, (E,), jnp.float32, -b2, b2)
        return w_fc, b_fc, w_proj, b_proj

    key = jax.random.PRNGKey(0)
    # tolerance loosened vs f32 reference because operands are cast to bf16 (f32 accumulate)
    ATOL = RTOL = 2e-2

    # --- test 1: config n_embd=32, ff=4 (H=128), bias=True, dropout eval-mode identity.
    #     Auto tiling -> weights-resident fused path (nk == 1).
    k_x, k_p, key = jax.random.split(key, 3)
    B, T, E, FF = 2, 8, 32, 4
    H = FF * E
    x = jax.random.normal(k_x, (B, T, E), dtype=jnp.float32)
    raw = make_params(k_p, E, H)
    prep = prepare_mlp_params(*raw)
    y = jax.block_until_ready(mlp_forward(x, prep))
    assert jnp.allclose(y, ref_mlp(x, *raw), atol=ATOL, rtol=RTOL), "mismatch (test 1)"

    # --- test 2: forced K-tiled path (th=128 -> 3 K steps), f32 output accumulates into o_ref;
    #     exercises row tiling, M/E zero-padding.
    k_x, k_p, key = jax.random.split(key, 3)
    B, T, E, FF = 2, 40, 48, 8      # M=80, E pads 48->128, H=384
    H = FF * E
    x = jax.random.normal(k_x, (B, T, E), dtype=jnp.float32)
    raw = make_params(k_p, E, H)
    prep = prepare_mlp_params(*raw, th=128)
    y = jax.block_until_ready(mlp_forward(x, prep, tm=16))
    assert jnp.allclose(y, ref_mlp(x, *raw), atol=ATOL, rtol=RTOL), "mismatch (test 2)"

    # --- test 3: bf16 input/output on the K-tiled path -> f32 scratch-accumulator kernel.
    x_bf = x.astype(jnp.bfloat16)
    y_bf = jax.block_until_ready(mlp_forward(x_bf, prep, tm=16))
    ref_bf = ref_mlp(x_bf.astype(jnp.float32), *raw)
    assert jnp.allclose(y_bf.astype(jnp.float32), ref_bf, atol=5e-2, rtol=5e-2), "mismatch (test 3)"

    # TODO(synk): training-mode dropout (stateful PRNG mask) not implemented; eval-mode identity only.
    print("KERNEL_OK")
</pallas_src>

<mosaic_0001>
module attributes {stable_mosaic.version = 11 : i64} {
  func.func @_mlp_kernel_fused(%arg0: i32, %arg1: i32, %arg2: memref<16x128xbf16, #tpu.memory_space<vmem>>, %arg3: memref<1x128x128xbf16, #tpu.memory_space<vmem>>, %arg4: memref<1x1x128xf32, #tpu.memory_space<vmem>>, %arg5: memref<1x128x128xbf16, #tpu.memory_space<vmem>>, %arg6: memref<1x128xf32, #tpu.memory_space<vmem>>, %arg7: memref<16x128xf32, #tpu.memory_space<vmem>>) attributes {dimension_semantics = [#tpu.dimension_semantics<parallel>, #tpu.dimension_semantics<arbitrary>], iteration_bounds = array<i64: 1, 1>, scalar_prefetch = 0 : i64, scratch_operands = 0 : i64, tpu.core_type = #tpu.core_type<tc>, window_params = [{transform_indices = @transform_0, window_bounds = array<i64: 16, 128>}, {transform_indices = @transform_1, window_bounds = array<i64: 1, 128, 128>}, {transform_indices = @transform_2, window_bounds = array<i64: 1, 1, 128>}, {transform_indices = @transform_3, window_bounds = array<i64: 1, 128, 128>}, {pipeline_mode = #tpu.pipeline_mode<synchronous>, transform_indices = @transform_4, window_bounds = array<i64: 1, 128>}, {transform_indices = @transform_5, window_bounds = array<i64: 16, 128>}]} {
    %c0 = arith.constant 0 : index
    %c0_0 = arith.constant 0 : index
    %0 = vector.load %arg2[%c0, %c0_0] : memref<16x128xbf16, #tpu.memory_space<vmem>>, vector<16x128xbf16>
    %c0_1 = arith.constant 0 : index
    %c0_2 = arith.constant 0 : index
    %c0_3 = arith.constant 0 : index
    %1 = vector.load %arg3[%c0_1, %c0_2, %c0_3] : memref<1x128x128xbf16, #tpu.memory_space<vmem>>, vector<1x128x128xbf16>
    %2 = vector.shape_cast %1 : vector<1x128x128xbf16> to vector<128x128xbf16>
    %cst = arith.constant dense<0.000000e+00> : vector<16x128xf32>
    %3 = tpu.matmul %0, %2, %cst {dimension_numbers = #tpu.dot_dimension_numbers<[1], [0], [0], [1], [0, 0, 1, 1], [], []>} : vector<16x128xbf16>, vector<128x128xbf16>, vector<16x128xf32> -> vector<16x128xf32>
    %c0_4 = arith.constant 0 : index
    %c0_5 = arith.constant 0 : index
    %c0_6 = arith.constant 0 : index
    %4 = vector.load %arg4[%c0_4, %c0_5, %c0_6] : memref<1x1x128xf32, #tpu.memory_space<vmem>>, vector<1x1x128xf32>
    %5 = vector.shape_cast %4 : vector<1x1x128xf32> to vector<1x128xf32>
    %6 = vector.broadcast %5 : vector<1x128xf32> to vector<16x128xf32>
    %7 = arith.addf %3, %6 : vector<16x128xf32>
    %cst_7 = arith.constant 5.000000e-01 : f32
    %8 = vector.broadcast %cst_7 : f32 to vector<16x128xf32>
    %9 = arith.mulf %8, %7 : vector<16x128xf32>
    %cst_8 = arith.constant 0.707106769 : f32
    %10 = vector.broadcast %cst_8 : f32 to vector<16x128xf32>
    %11 = arith.mulf %7, %10 : vector<16x128xf32>
    %12 = math.erf %11 : vector<16x128xf32>
    %cst_9 = arith.constant 1.000000e+00 : f32
    %13 = vector.broadcast %cst_9 : f32 to vector<16x128xf32>
    %14 = arith.addf %13, %12 : vector<16x128xf32>
    %15 = arith.mulf %9, %14 : vector<16x128xf32>
    %16 = arith.truncf %15 : vector<16x128xf32> to vector<16x128xbf16>
    %c0_10 = arith.constant 0 : index
    %c0_11 = arith.constant 0 : index
    %c0_12 = arith.constant 0 : index
    %17 = vector.load %arg5[%c0_10, %c0_11, %c0_12] : memref<1x128x128xbf16, #tpu.memory_space<vmem>>, vector<1x128x128xbf16>
    %18 = vector.shape_cast %17 : vector<1x128x128xbf16> to vector<128x128xbf16>
    %cst_13 = arith.constant dense<0.000000e+00> : vector<16x128xf32>
    %19 = tpu.matmul %16, %18, %cst_13 {dimension_numbers = #tpu.dot_dimension_numbers<[1], [0], [0], [1], [0, 0, 1, 1], [], []>} : vector<16x128xbf16>, vector<128x128xbf16>, vector<16x128xf32> -> vector<16x128xf32>
    %c0_14 = arith.constant 0 : index
    %c0_15 = arith.constant 0 : index
    %20 = vector.load %arg6[%c0_14, %c0_15] : memref<1x128xf32, #tpu.memory_space<vmem>>, vector<1x128xf32>
    %21 = vector.broadcast %20 : vector<1x128xf32> to vector<16x128xf32>
    %22 = arith.addf %19, %21 : vector<16x128xf32>
    %c0_16 = arith.constant 0 : index
    %c0_17 = arith.constant 0 : index
    %23 = vector.load %arg7[%c0_16, %c0_17] : memref<16x128xf32, #tpu.memory_space<vmem>>, vector<16x128xf32>
    tpu.vector_store %arg7[%c0_16, %c0_17], %22 {strides = array<i32>} : memref<16x128xf32, #tpu.memory_space<vmem>>, vector<16x128xf32>,
    return
  }
  func.func @transform_0(%arg0: i32, %arg1: i32) -> (i32, i32) {
    %c0_i32 = arith.constant 0 : i32
    %c0_i32_0 = arith.constant 0 : i32
    return %arg0, %c0_i32 : i32, i32
  }
  func.func @transform_1(%arg0: i32, %arg1: i32) -> (i32, i32, i32) {
    %c0_i32 = arith.constant 0 : i32
    %c0_i32_0 = arith.constant 0 : i32
    %c0_i32_1 = arith.constant 0 : i32
    return %arg1, %c0_i32, %c0_i32_0 : i32, i32, i32
  }
  func.func @transform_2(%arg0: i32, %arg1: i32) -> (i32, i32, i32) {
    %c0_i32 = arith.constant 0 : i32
    %c0_i32_0 = arith.constant 0 : i32
    %c0_i32_1 = arith.constant 0 : i32
    return %arg1, %c0_i32, %c0_i32_0 : i32, i32, i32
  }
  func.func @transform_3(%arg0: i32, %arg1: i32) -> (i32, i32, i32) {
    %c0_i32 = arith.constant 0 : i32
    %c0_i32_0 = arith.constant 0 : i32
    %c0_i32_1 = arith.constant 0 : i32
    return %arg1, %c0_i32, %c0_i32_0 : i32, i32, i32
  }
  func.func @transform_4(%arg0: i32, %arg1: i32) -> (i32, i32) {
    %c0_i32 = arith.constant 0 : i32
    %c0_i32_0 = arith.constant 0 : i32
    %c0_i32_1 = arith.constant 0 : i32
    return %c0_i32, %c0_i32_0 : i32, i32
  }
  func.func @transform_5(%arg0: i32, %arg1: i32) -> (i32, i32) {
    %c0_i32 = arith.constant 0 : i32
    %c0_i32_0 = arith.constant 0 : i32
    return %arg0, %c0_i32 : i32, i32
  }
}

</mosaic_0001>

<bundles_post_ra>
// kernel: tpu_custom_call.1
= control target key start
LH: loop header
LB: loop body
LE: loop exit
PB: predicated region body
PF: predicated region fallthrough
CT: control target
= control target key end

     0   :  { %10 = vsyncpa [#allocation3], 0  ;;  %s638_s0 = inlined_call_operand.hbm [shape: bf16[16,128], index: 0, kind: input, shape index: {}]   ;;  %s639_s1 = inlined_call_operand.hbm [shape: bf16[1,128,128], index: 1, kind: input, shape index: {}]   ;;  %s640_s2 = inlined_call_operand.vmem [shape: f32[1,1,128], index: 2, kind: input, shape index: {}]   ;;  %s641_s3 = inlined_call_operand.hbm [shape: bf16[1,128,128], index: 3, kind: input, shape index: {}]   ;;  %s642_s4 = inlined_call_operand.vmem [shape: f32[1,128], index: 4, kind: input, shape index: {}]   ;;  %s643_s5 = inlined_call_operand.hbm [shape: f32[16,128], index: 5, kind: output, shape index: {}]  }
   0x1   :  { %11 = vsyncpa [#allocation6], 0 }
   0x2   :  { %12 = vsyncpa [#allocation4], 0  ;;  %s528_s18 = smov [#allocation5]   ;;  %s529_s20 = smov [#allocation2]  }
   0x3   :  { %s30_s19 = sshll.u32 %s528_s18, 4  ;;  %s18_s21 = sshll.u32 %s529_s20, 4  ;;  %s31_s19 = int_to_ptr.vmem [resolvable:$true] %s30_s19  ;;  %s568_s21 = int_to_ptr.vmem [resolvable:$true] %s18_s21 }
   0x4   :  { %s434_s24 = scalar_lea.hbm %s639_s1, 1024 }
   0x5   :  { %p435_p0 = scmp.ne.s32.totalorder %s639_s1, %s434_s24  ;;  %p438_p1 = scmp.lt.u32.totalorder %s434_s24, %s639_s1 }
   0x7   :  { %p440_p2 = pnand %p438_p1, %p435_p0 }
   0x9   :  { %443 = shalt.err (!%p440_p2)
}
   0xa   :  { %s444_s29 = scalar_lea.vmem %s31_s19, 1024  ;;  %p449_p4 = scmp.lt.s32.totalorder %s31_s19, %s31_s19 }
   0xb   :  { %p445_p3 = scmp.ne.s32.totalorder %s31_s19, %s444_s29  ;;  %p450_p5 = scmp.lt.s32.totalorder %s444_s29, %s444_s29 }
   0xd   :  { %p451_p6 = por %p450_p5, %p449_p4 }
   0xf   :  { %p452_p7 = pnand %p451_p6, %p445_p3 }
  0x11   :  { %455 = shalt.err (!%p452_p7)
}
  0x12   :  { %s530_s30 = smov 64   ;;  %s531_s6 = smov 4  }
  0x13   :  { %36 = dma.hbm_to_vmem [thread:$0]  %s639_s1, 1024, %s31_s19, [#allocation6], %s530_s30, %s530_s30, %s531_s6  }
  0x14   :  { %s456_s11 = scalar_lea.hbm %s638_s0, 128 }
  0x15   :  { %p457_p8 = scmp.ne.s32.totalorder %s638_s0, %s456_s11  ;;  %p460_p9 = scmp.lt.u32.totalorder %s456_s11, %s638_s0 }
  0x17   :  { %p462_p10 = pnand %p460_p9, %p457_p8 }
  0x19   :  { %465 = shalt.err (!%p462_p10)
}
  0x1a   :  { %s466_s16 = scalar_lea.vmem %s568_s21, 128  ;;  %p471_p12 = scmp.lt.s32.totalorder %s568_s21, %s568_s21 }
  0x1b   :  { %p467_p11 = scmp.ne.s32.totalorder %s568_s21, %s466_s16  ;;  %p472_p13 = scmp.lt.s32.totalorder %s466_s16, %s466_s16 }
  0x1d   :  { %p473_p0 = por %p472_p13, %p471_p12 }
  0x1f   :  { %p474_p1 = pnand %p473_p0, %p467_p11 }
  0x21   :  { %477 = shalt.err (!%p474_p1)
}
  0x22   :  { %24 = dma.hbm_to_vmem [thread:$0]  %s638_s0, 128, %s568_s21, [#allocation3], %s530_s30, %s530_s30, %s531_s6  }
  0x23   :  { %s532_s18 = smov [#allocation7]   ;;  %s478_s23 = scalar_lea.hbm %s641_s3, 1024 }
  0x24   :  { %s44_s19 = sshll.u32 %s532_s18, 4  ;;  %p479_p2 = scmp.ne.s32.totalorder %s641_s3, %s478_s23  ;;  %s45_s19 = int_to_ptr.vmem [resolvable:$true] %s44_s19 }
  0x25   :  { %p482_p3 = scmp.lt.u32.totalorder %s478_s23, %s641_s3 }
  0x27   :  { %p484_p4 = pnand %p482_p3, %p479_p2 }
  0x29   :  { %487 = shalt.err (!%p484_p4)
}
  0x2a   :  { %s488_s28 = scalar_lea.vmem %s45_s19, 1024  ;;  %p493_p6 = scmp.lt.s32.totalorder %s45_s19, %s45_s19 }
  0x2b   :  { %p489_p5 = scmp.ne.s32.totalorder %s45_s19, %s488_s28  ;;  %p494_p7 = scmp.lt.s32.totalorder %s488_s28, %s488_s28 }
  0x2d   :  { %p495_p8 = por %p494_p7, %p493_p6 }
  0x2f   :  { %p496_p9 = pnand %p495_p8, %p489_p5 }
  0x31   :  { %499 = shalt.err (!%p496_p9)
}
  0x32   :  { %50 = dma.hbm_to_vmem [thread:$0]  %s641_s3, 1024, %s45_s19, [#allocation6], %s530_s30, %s530_s30, %s531_s6  }
  0x33   :  { %522 = dma.done.wait [#allocation3], 128  }
  0x34   :  { %523 = vsyncadd [#allocation3], 4294967168 }
  0x35   :  { %524 = dma.done.wait [#allocation6], 2048  }
  0x36   :  { %525 = vsyncadd [#allocation6], 4294965248  ;;  %v533_v0 = vmov 0.0   ;;  %vm534_vm0 = vmmov 0   ;;  %v413_v1 = vld [vmem:[#allocation5] sm:$0xff]   ;;  %v414_v2 = vld [vmem:[#allocation5 + $0x8] sm:$0xff]  }
  0x37   :  { %363 = vmatprep.subr.bf16.mxu0 %v533_v0  ;;  %379 = vmatprep.mubr.msk.bf16.mxu0 %vm534_vm0, %v533_v0  ;;  %v415_v3 = vld [vmem:[#allocation5 + $0x10] sm:$0xff]   ;;  %v422_v4 = vld [vmem:[#allocation7] sm:$0xff]   ;;  %v416_v5 = vld [vmem:[#allocation5 + $0x18] sm:$0xff]   ;;  %s535_s6 = smov [#allocation8]  }
  0x38   :  { %383 = vmatprep.subr.bf16.mxu1 %v533_v0  ;;  %399 = vmatprep.mubr.msk.bf16.mxu1 %vm534_vm0, %v533_v0  ;;  %v423_v6 = vld [vmem:[#allocation7 + $0x8] sm:$0xff]   ;;  %v417_v7 = vld [vmem:[#allocation5 + $0x20] sm:$0xff]   ;;  %v419_v9 = vld [vmem:[#allocation5 + $0x30] sm:$0xff]   ;;  %s313_s7 = sshll.u32 %s535_s6, 4  ;;  %s314_s7 = int_to_ptr.vmem [resolvable:$true] %s313_s7 }
  0x39   :  { %364 = vmatpush3.bf16.msra.mxu0 %v413_v1  ;;  %384 = vmatpush3.bf16.msra.mxu1 %v422_v4  ;;  %v418_v8 = vld [vmem:[#allocation5 + $0x28] sm:$0xff]   ;;  %v420_v10 = vld [vmem:[#allocation5 + $0x38] sm:$0xff]   ;;  %v424_v12 = vld [vmem:[#allocation7 + $0x10] sm:$0xff]   ;;  %s500_s8 = scalar_lea.vmem %s314_s7, 256  ;;  %p505_p11 = scmp.lt.s32.totalorder %s314_s7, %s314_s7 }
  0x3a   :  { %365 = vmatprep.subr.bf16.mxu0 %v533_v0  ;;  %385 = vmatprep.subr.bf16.mxu1 %v533_v0  ;;  %v421_v11 = vld [vmem:[#allocation2] sm:$0xff]   ;;  %v426_v14 = vld [vmem:[#allocation7 + $0x20] sm:$0xff]   ;;  %v427_v15 = vld [vmem:[#allocation7 + $0x28] sm:$0xff]   ;;  %p501_p10 = scmp.ne.s32.totalorder %s314_s7, %s500_s8  ;;  %p506_p12 = scmp.lt.s32.totalorder %s500_s8, %s500_s8 }
  0x3b   :  { %v425_v13 = vld [vmem:[#allocation7 + $0x18] sm:$0xff]   ;;  %v428_v16 = vld [vmem:[#allocation7 + $0x30] sm:$0xff]  }
  0x3c   :  { %v429_v17 = vld [vmem:[#allocation7 + $0x38] sm:$0xff]   ;;  %p507_p13 = por %p506_p12, %p505_p11 }
  0x3d   :  { %366 = vmatpush3.bf16.msra.mxu0 %v414_v2  ;;  %386 = vmatpush3.bf16.msra.mxu1 %v423_v6  ;;  %v326_v18 = vld [vmem:[%s640_s2] ss:$0 sm:$0xff] }
  0x3e   :  { %367 = vmatprep.subr.bf16.mxu0 %v533_v0  ;;  %387 = vmatprep.subr.bf16.mxu1 %v533_v0  ;;  %v336_v36 = vld [vmem:[%s642_s4] ss:$0 sm:$0xff]  ;;  %p508_p0 = pnand %p507_p13, %p501_p10 }
  0x41   :  { %368 = vmatpush3.bf16.msra.mxu0 %v415_v3  ;;  %388 = vmatpush3.bf16.msra.mxu1 %v424_v12 }
  0x42   :  { %369 = vmatprep.subr.bf16.mxu0 %v533_v0  ;;  %389 = vmatprep.subr.bf16.mxu1 %v533_v0 }
  0x45   :  { %370 = vmatpush3.bf16.msra.mxu0 %v416_v5  ;;  %390 = vmatpush3.bf16.msra.mxu1 %v425_v13 }
  0x46   :  { %371 = vmatprep.subr.bf16.mxu0 %v533_v0  ;;  %391 = vmatprep.subr.bf16.mxu1 %v533_v0 }
  0x49   :  { %372 = vmatpush3.bf16.msra.mxu0 %v417_v7  ;;  %392 = vmatpush3.bf16.msra.mxu1 %v426_v14 }
  0x4a   :  { %373 = vmatprep.subr.bf16.mxu0 %v533_v0  ;;  %393 = vmatprep.subr.bf16.mxu1 %v533_v0 }
  0x4d   :  { %374 = vmatpush3.bf16.msra.mxu0 %v418_v8  ;;  %394 = vmatpush3.bf16.msra.mxu1 %v427_v15 }
  0x4e   :  { %375 = vmatprep.subr.bf16.mxu0 %v533_v0  ;;  %395 = vmatprep.subr.bf16.mxu1 %v533_v0 }
  0x51   :  { %376 = vmatpush3.bf16.msra.mxu0 %v419_v9  ;;  %396 = vmatpush3.bf16.msra.mxu1 %v428_v16 }
  0x52   :  { %377 = vmatprep.subr.bf16.mxu0 %v533_v0  ;;  %397 = vmatprep.subr.bf16.mxu1 %v533_v0 }
  0x55   :  { %378 = vmatpush3.bf16.msra.mxu0 %v420_v10  ;;  %398 = vmatpush3.bf16.msra.mxu1 %v429_v17 }
  0x58   :  { %380 = vmatmul.mubr.bf16.vlgmr.msra.gmra.mrb[0].mxu0 %v421_v11 }
 0x12b   :  { %v176_v19 = vpop.f32.mrb[0].mxu0 }
 0x12c   :  { %v177_v20 = vadd.f32 %v326_v18, %v176_v19  ;;  %v381_v21 = vpop.f32.mrb[1].mxu0 }
 0x12d   :  { %v179_v22 = vpop.f32.mrb[2].mxu0 }
 0x12e   :  { %v185_v23 = vmul.f32 0.70710677, %v177_v20  ;;  %v180_v24 = vadd.f32 %v326_v18, %v179_v22  ;;  %v382_v25 = vpop.f32.mrb[3].mxu0  ;;  %v183_v30 = vmul.f32 0.5, %v177_v20 }
 0x130   :  { %430 = verf.f32 %v185_v23  ;;  %v186_v26 = vmul.f32 0.70710677, %v180_v24  ;;  %v184_v31 = vmul.f32 0.5, %v180_v24 }
 0x132   :  { %432 = verf.f32 %v186_v26 }
 0x13a   :  { %v431_v27 = vpop.eup %430 }
 0x13b   :  { %v189_v28 = vadd.f32 1.0, %v431_v27 }
 0x13c   :  { %v433_v29 = vpop.eup %432 }
 0x13d   :  { %v190_v32 = vadd.f32 1.0, %v433_v29  ;;  %v191_v33 = vmul.f32 %v189_v28, %v183_v30 }
 0x13f   :  { %v192_v34 = vmul.f32 %v190_v32, %v184_v31 }
 0x141   :  { %v193_v35 = vpack.c.bf16 %v192_v34, %v191_v33 }
 0x143   :  { %400 = vmatmul.mubr.bf16.vlgmr.msra.gmra.mrb[0].mxu1 %v193_v35 }
 0x216   :  { %v299_v37 = vpop.f32.mrb[0].mxu1 }
 0x217   :  { %v300_v38 = vadd.f32 %v336_v36, %v299_v37  ;;  %v401_v39 = vpop.f32.mrb[1].mxu1 }
 0x218   :  { %v302_v40 = vpop.f32.mrb[2].mxu1 }
 0x219   :  { %306 = vst [vmem:[#allocation8] sm:$0xff] %v300_v38  ;;  %v303_v41 = vadd.f32 %v336_v36, %v302_v40  ;;  %v402_v42 = vpop.f32.mrb[3].mxu1 }
 0x21b   :  { %307 = vst [vmem:[#allocation8 + $0x8] sm:$0xff] %v303_v41 }
 0x21c   :  { %511 = shalt.err (!%p508_p0)
}
 0x21d   :  { %s512_s10 = scalar_lea.hbm %s643_s5, 256 }
 0x21e   :  { %p513_p1 = scmp.ne.s32.totalorder %s643_s5, %s512_s10  ;;  %p516_p2 = scmp.lt.u32.totalorder %s512_s10, %s643_s5 }
 0x220   :  { %p518_p3 = pnand %p516_p2, %p513_p1 }
 0x222   :  { %521 = shalt.err (!%p518_p3)
}
 0x223   :  { %s536_s15 = smov 128   ;;  %s537_s16 = smov 8  }
 0x224   :  { %319 = dma.vmem_to_hbm [thread:$0]  %s314_s7, 256, %s643_s5, [#allocation4], %s536_s15, %s536_s15, %s537_s16  }
 0x225   :  { %526 = dma.done.wait [#allocation4], 256  }
 0x226   :  { %527 = vsyncadd [#allocation4], 4294967040 }
 0x227   :  { %323 = vsyncpa [#allocation3], 1 }
 0x228   :  { %324 = vsyncpa [#allocation6], 1 }
 0x229   :  { %325 = vsyncpa [#allocation4], 1 }

</bundles_post_ra>
